<compile_context>
chip_gen: v5e
topology: v5e:2x2
jax: 0.10.0
libtpu: 0.0.40
codegen_flags: <defaults>
</compile_context>

<pallas_src>
import functools

import jax
import jax.numpy as jnp
import numpy as np
from jax.experimental import pallas as pl
from jax.experimental.pallas import tpu as pltpu


def _round_up(a, b):
    return (a + b - 1) // b * b


def gaussian_loss_kernel(x_ref, lbl_ref, c_ref, out_ref, *, batch, num_classes):
    # x_ref:   (TB, D)      input dtype  VMEM - batch tile (upcast in-kernel)
    # lbl_ref: (TB, 1)      i32          VMEM - labels tile
    # c_ref:   (C, D)       f32          VMEM - full centers (resident)
    # out_ref: (1, 1, 128)  f32          VMEM - lane-dense per-tile partial sum
    tb = x_ref.shape[0]
    tile_start = pl.program_id(0) * tb

    x = x_ref[...].astype(jnp.float32)                        # (TB, D)
    c = jnp.maximum(c_ref[...].astype(jnp.float32), 0.1)      # centers.clamp(min=0.1)

    # MXU one-hot gather: centers[labels] = onehot (TB, C) @ c (C, D).
    lbl = lbl_ref[...]                                        # (TB, 1) i32
    classes = jax.lax.broadcasted_iota(jnp.int32, (tb, num_classes), 1)
    onehot = (lbl == classes).astype(jnp.float32)             # exact 0/1, f32
    gathered = jnp.dot(onehot, c, preferred_element_type=jnp.float32)  # (TB, D)

    diff = x - gathered
    d = jnp.sum(diff * diff, axis=1, keepdims=True)           # (TB, 1) diag dist
    d = jnp.clip(d, 1e-12, 1e12)

    # Mask rows past the true batch (partial last tile loads undefined data;
    # the select keeps any Inf/NaN out of the partial sum).
    rows = tile_start + jax.lax.broadcasted_iota(jnp.int32, (tb, 1), 0)
    d = jnp.where(rows < batch, d, 0.0)

    out_ref[...] = jnp.broadcast_to(jnp.sum(d), out_ref.shape).astype(out_ref.dtype)


def gaussian_loss(x, centers, labels, *, tile_b=512):
    """x: (B, D), centers: (C, D) f32, labels: (B,) int -> scalar f32 loss."""
    B, D = x.shape
    C, Dc = centers.shape
    assert D == Dc

    labels2d = labels.astype(jnp.int32).reshape(B, 1)

    # Batch tile: multiple of 8, capped; ensure >=2 grid steps when B allows it
    # so the "parallel" axis can shard across both v7x TensorCores.
    cap = max(_round_up(tile_b, 8), 8)
    if B <= 2 * cap:
        TB = max(8, min(_round_up(pl.cdiv(B, 2), 8), cap))
    else:
        TB = cap
    num_tiles = pl.cdiv(B, TB)   # partial last block handled by in-kernel mask

    kernel = functools.partial(gaussian_loss_kernel, batch=B, num_classes=C)

    partials = pl.pallas_call(
        kernel,
        out_shape=jax.ShapeDtypeStruct((num_tiles, 1, 128), jnp.float32),
        grid=(num_tiles,),
        in_specs=[
            pl.BlockSpec((TB, D), lambda i: (i, 0)),   # x batch tile (orig dtype)
            pl.BlockSpec((TB, 1), lambda i: (i, 0)),   # labels tile
            pl.BlockSpec((C, D), lambda i: (0, 0)),    # centers resident
        ],
        out_specs=pl.BlockSpec((1, 1, 128), lambda i: (i, 0, 0)),
        compiler_params=pltpu.CompilerParams(
            dimension_semantics=("parallel",),         # megacore-shardable
        ),
    )(x, labels2d, centers)

    diag_sum = jnp.sum(partials[:, 0, 0])
    # Every masked-out entry contributes clamp(0, 1e-12, 1e12) = 1e-12.
    return diag_sum / jnp.float32(B) + jnp.float32((C - 1) * 1e-12)


def gaussian_loss_ref(x, centers, labels):
    """Pure-JAX reference mirroring the PyTorch forward."""
    B = x.shape[0]
    C = centers.shape[0]
    xf = x.astype(jnp.float32)
    c = jnp.maximum(centers.astype(jnp.float32), 0.1)
    distmat = (
        jnp.sum(xf * xf, axis=1, keepdims=True)
        + jnp.sum(c * c, axis=1)[None, :]
        - 2.0 * xf @ c.T
    )
    mask = (labels[:, None] == jnp.arange(C)[None, :]).astype(jnp.float32)
    dist = jnp.clip(distmat * mask, 1e-12, 1e12)
    return jnp.sum(dist) / B


if __name__ == "__main__":
    # Module defaults: num_classes=64, feat_dim=640. Small batch.
    num_classes = 64
    feat_dim = 640
    batch = 8

    key = jax.random.PRNGKey(0)
    k_centers, k_x, k_labels = jax.random.split(key, 3)

    # torch.normal(mean=0.3, std=0.1, ...) analogue for the centers parameter.
    centers = 0.3 + 0.1 * jax.random.normal(
        k_centers, (num_classes, feat_dim), dtype=jnp.float32
    )
    x = jax.random.normal(k_x, (batch, feat_dim), dtype=jnp.float32)
    labels = jax.random.randint(k_labels, (batch,), 0, num_classes, dtype=jnp.int32)

    loss = jax.block_until_ready(gaussian_loss(x, centers, labels))
    ref = jax.block_until_ready(gaussian_loss_ref(x, centers, labels))
    np.testing.assert_allclose(np.asarray(loss), np.asarray(ref), rtol=1e-3, atol=1e-2)

    print("KERNEL_OK")
</pallas_src>

<mosaic_0001>
module attributes {stable_mosaic.version = 11 : i64} {
  func.func @gaussian_loss_kernel(%arg0: i32, %arg1: memref<8x640xf32, #tpu.memory_space<vmem>>, %arg2: memref<8x1xi32, #tpu.memory_space<vmem>>, %arg3: memref<64x640xf32, #tpu.memory_space<vmem>>, %arg4: memref<1x1x128xf32, #tpu.memory_space<vmem>>) attributes {dimension_semantics = [#tpu.dimension_semantics<parallel>], iteration_bounds = array<i64: 1>, scalar_prefetch = 0 : i64, scratch_operands = 0 : i64, tpu.core_type = #tpu.core_type<tc>, window_params = [{transform_indices = @transform_0, window_bounds = array<i64: 8, 640>}, {transform_indices = @transform_1, window_bounds = array<i64: 8, 1>}, {pipeline_mode = #tpu.pipeline_mode<synchronous>, transform_indices = @transform_2, window_bounds = array<i64: 64, 640>}, {transform_indices = @transform_3, window_bounds = array<i64: 1, 1, 128>}]} {
    %c8_i32 = arith.constant 8 : i32
    %0 = arith.muli %arg0, %c8_i32 : i32
    %c0 = arith.constant 0 : index
    %c0_0 = arith.constant 0 : index
    %1 = vector.load %arg1[%c0, %c0_0] : memref<8x640xf32, #tpu.memory_space<vmem>>, vector<8x640xf32>
    %c0_1 = arith.constant 0 : index
    %c0_2 = arith.constant 0 : index
    %2 = vector.load %arg3[%c0_1, %c0_2] : memref<64x640xf32, #tpu.memory_space<vmem>>, vector<64x640xf32>
    %cst = arith.constant 1.000000e-01 : f32
    %3 = vector.broadcast %cst : f32 to vector<64x640xf32>
    %4 = arith.maximumf %2, %3 : vector<64x640xf32>
    %c0_3 = arith.constant 0 : index
    %c0_4 = arith.constant 0 : index
    %5 = vector.load %arg2[%c0_3, %c0_4] : memref<8x1xi32, #tpu.memory_space<vmem>>, vector<8x1xi32>
    %6 = tpu.iota {dimensions = array<i32: 1>} : vector<8x64xi32>
    %7 = vector.broadcast %5 : vector<8x1xi32> to vector<8x64xi32>
    %8 = arith.cmpi eq, %7, %6 : vector<8x64xi32>
    %9 = arith.extui %8 : vector<8x64xi1> to vector<8x64xi32>
    %10 = arith.sitofp %9 : vector<8x64xi32> to vector<8x64xf32>
    %cst_5 = arith.constant dense<0.000000e+00> : vector<8x640xf32>
    %11 = tpu.matmul %10, %4, %cst_5 {dimension_numbers = #tpu.dot_dimension_numbers<[1], [0], [0], [1], [0, 0, 1, 1], [], []>} : vector<8x64xf32>, vector<64x640xf32>, vector<8x640xf32> -> vector<8x640xf32>
    %12 = arith.subf %1, %11 : vector<8x640xf32>
    %13 = arith.mulf %12, %12 : vector<8x640xf32>
    %cst_6 = arith.constant dense<0.000000e+00> : vector<8xf32>
    %14 = vector.multi_reduction <add>, %13, %cst_6 [1] : vector<8x640xf32> to vector<8xf32>
    %15 = vector.shape_cast %14 : vector<8xf32> to vector<8x1xf32>
    %cst_7 = arith.constant 9.99999996E-13 : f32
    %cst_8 = arith.constant 9.99999995E+11 : f32
    %16 = vector.broadcast %cst_7 : f32 to vector<8x1xf32>
    %17 = arith.maximumf %16, %15 : vector<8x1xf32>
    %18 = vector.broadcast %cst_8 : f32 to vector<8x1xf32>
    %19 = arith.minimumf %18, %17 : vector<8x1xf32>
    %20 = tpu.iota {dimensions = array<i32: 0>} : vector<8x1xi32>
    %21 = vector.broadcast %0 : i32 to vector<8x1xi32>
    %22 = arith.addi %21, %20 : vector<8x1xi32>
    %c8_i32_9 = arith.constant 8 : i32
    %23 = vector.broadcast %c8_i32_9 : i32 to vector<8x1xi32>
    %24 = arith.cmpi slt, %22, %23 : vector<8x1xi32>
    %cst_10 = arith.constant 0.000000e+00 : f32
    %25 = vector.broadcast %cst_10 : f32 to vector<8x1xf32>
    %26 = arith.select %24, %19, %25 : vector<8x1xi1>, vector<8x1xf32>
    %27 = vector.shape_cast %26 : vector<8x1xf32> to vector<1x8x1xf32>
    %cst_11 = arith.constant dense<0.000000e+00> : vector<1xf32>
    %28 = vector.multi_reduction <add>, %27, %cst_11 [1, 2] : vector<1x8x1xf32> to vector<1xf32>
    %29 = vector.shape_cast %28 : vector<1xf32> to vector<1x1x1xf32>
    %30 = vector.extract %29[0, 0, 0] : f32 from vector<1x1x1xf32>
    %31 = vector.broadcast %30 : f32 to vector<1x1x128xf32>
    %c0_12 = arith.constant 0 : index
    %c0_13 = arith.constant 0 : index
    %c0_14 = arith.constant 0 : index
    %32 = vector.load %arg4[%c0_12, %c0_13, %c0_14] : memref<1x1x128xf32, #tpu.memory_space<vmem>>, vector<1x1x128xf32>
    tpu.vector_store %arg4[%c0_12, %c0_13, %c0_14], %31 {strides = array<i32>} : memref<1x1x128xf32, #tpu.memory_space<vmem>>, vector<1x1x128xf32>,
    return
  }
  func.func @transform_0(%arg0: i32) -> (i32, i32) {
    %c0_i32 = arith.constant 0 : i32
    %c0_i32_0 = arith.constant 0 : i32
    return %arg0, %c0_i32 : i32, i32
  }
  func.func @transform_1(%arg0: i32) -> (i32, i32) {
    %c0_i32 = arith.constant 0 : i32
    %c0_i32_0 = arith.constant 0 : i32
    return %arg0, %c0_i32 : i32, i32
  }
  func.func @transform_2(%arg0: i32) -> (i32, i32) {
    %c0_i32 = arith.constant 0 : i32
    %c0_i32_0 = arith.constant 0 : i32
    %c0_i32_1 = arith.constant 0 : i32
    return %c0_i32, %c0_i32_0 : i32, i32
  }
  func.func @transform_3(%arg0: i32) -> (i32, i32, i32) {
    %c0_i32 = arith.constant 0 : i32
    %c0_i32_0 = arith.constant 0 : i32
    %c0_i32_1 = arith.constant 0 : i32
    return %arg0, %c0_i32, %c0_i32_0 : i32, i32, i32
  }
}

</mosaic_0001>

<bundles_post_ra>
// kernel: tpu_custom_call.1
= control target key start
LH: loop header
LB: loop body
LE: loop exit
PB: predicated region body
PF: predicated region fallthrough
CT: control target
= control target key end

     0   :  { %8 = vsyncpa [#allocation3], 0  ;;  %s432_s0 = inlined_call_operand.hbm [shape: f32[8,640], index: 0, kind: input, shape index: {}]   ;;  %s433_s1 = inlined_call_operand.vmem [shape: s32[8,1], index: 1, kind: input, shape index: {}]   ;;  %s434_s2 = inlined_call_operand.hbm [shape: f32[64,640], index: 2, kind: input, shape index: {}]   ;;  %s435_s3 = inlined_call_operand.hbm [shape: f32[1,1,128], index: 3, kind: output, shape index: {}]  }
   0x1   :  { %9 = vsyncpa [#allocation6], 0 }
   0x2   :  { %10 = vsyncpa [#allocation4], 0  ;;  %s16_s14 = sshll.u32 %s432_s0, 4  ;;  %s393_s15 = smov [#allocation2]   ;;  %s17_s14 = int_to_ptr.hbm [resolvable:$true] %s16_s14 }
   0x3   :  { %s18_s16 = sshll.u32 %s393_s15, 4  ;;  %s28_s19 = sshll.u32 %s434_s2, 4  ;;  %s19_s16 = int_to_ptr.vmem [resolvable:$true] %s18_s16  ;;  %s29_s19 = int_to_ptr.hbm [resolvable:$true] %s28_s19 }
   0x4   :  { %21 = dma.hbm_to_vmem [thread:$0]  %s17_s14, 640, %s19_s16, [#allocation3]  }
   0x5   :  { %s394_s20 = smov [#allocation5]   ;;  %s395_s22 = smov 640  }
   0x6   :  { %s30_s21 = sshll.u32 %s394_s20, 4  ;;  %s396_s23 = smov 40   ;;  %s31_s21 = int_to_ptr.vmem [resolvable:$true] %s30_s21 }
   0x7   :  { %36 = dma.hbm_to_vmem [thread:$0]  %s29_s19, 5120, %s31_s21, [#allocation6], %s395_s22, %s395_s22, %s396_s23  }
   0x8   :  { %387 = dma.done.wait [#allocation3], 640  }
   0x9   :  { %388 = vsyncadd [#allocation3], 4294966656 }
   0xa   :  { %389 = dma.done.wait [#allocation6], 5120  }
   0xb   :  { %390 = vsyncadd [#allocation6], 4294962176  ;;  %v397_v0 = vmov 0   ;;  %v131_v1 = vld [vmem:[%s433_s1] sm:$0xff]  ;;  %v81_v3 = vld [vmem:[#allocation5 + $0xf0] sm:$0xff]  ;;  %vm140_vm0 = vcmask 523264  }
   0xc   :  { %314 = vset.pattern.permute.xlu0 %v397_v0  ;;  %v86_v2 = vld [vmem:[#allocation5 + $0x118] sm:$0xff]  ;;  %v121_v5 = vmax.f32 %v81_v3, 0.1  ;;  %v76_v6 = vld [vmem:[#allocation5 + $0xc8] sm:$0xff]  ;;  %v71_v7 = vld [vmem:[#allocation5 + $0xa0] sm:$0xff]  ;;  %vm268_vm2 = vcmask 7168  }
   0xd   :  { %135 = vperm.xlu0 %314, %v131_v1   ;;  %v126_v4 = vmax.f32 %v86_v2, 0.1  ;;  %v116_v8 = vmax.f32 %v76_v6, 0.1  ;;  %v87_v9 = vld [vmem:[#allocation5 + $0x120] sm:$0xff]  ;;  %v88_v10 = vld [vmem:[#allocation5 + $0x128] sm:$0xff] }
   0xe   :  { %v127_v11 = vmax.f32 %v87_v9, 0.1  ;;  %v128_v12 = vmax.f32 %v88_v10, 0.1  ;;  %v89_v13 = vld [vmem:[#allocation5 + $0x130] sm:$0xff]  ;;  %v66_v14 = vld [vmem:[#allocation5 + $0x78] sm:$0xff] }
   0xf   :  { %152 = vmatpush.msra.mxu0 %v126_v4  ;;  %v111_v15 = vmax.f32 %v71_v7, 0.1  ;;  %v129_v16 = vmax.f32 %v89_v13, 0.1  ;;  %v82_v17 = vld [vmem:[#allocation5 + $0xf8] sm:$0xff]  ;;  %v83_v18 = vld [vmem:[#allocation5 + $0x100] sm:$0xff] }
  0x10   :  { %172 = vmatpush.msra.mxu1 %v127_v11  ;;  %v122_v19 = vmax.f32 %v82_v17, 0.1  ;;  %v123_v20 = vmax.f32 %v83_v18, 0.1  ;;  %v84_v21 = vld [vmem:[#allocation5 + $0x108] sm:$0xff]  ;;  %v61_v22 = vld [vmem:[#allocation5 + $0x50] sm:$0xff]  ;;  %192 = vmatpush.msra.mxu2 %v128_v12  ;;  %v132_v18 = vlaneseq }
  0x11   :  { %153 = vmatpush.msra.mxu0 %v121_v5  ;;  %212 = vmatpush.msra.mxu3 %v129_v16  ;;  %v106_v23 = vmax.f32 %v66_v14, 0.1  ;;  %v124_v24 = vmax.f32 %v84_v21, 0.1  ;;  %v77_v25 = vld [vmem:[#allocation5 + $0xd0] sm:$0xff]  ;;  %v78_v26 = vld [vmem:[#allocation5 + $0xd8] sm:$0xff] }
  0x12   :  { %173 = vmatpush.msra.mxu1 %v122_v19  ;;  %v117_v27 = vmax.f32 %v77_v25, 0.1  ;;  %v118_v28 = vmax.f32 %v78_v26, 0.1  ;;  %v79_v29 = vld [vmem:[#allocation5 + $0xe0] sm:$0xff]  ;;  %v56_v30 = vld [vmem:[#allocation5 + $0x28] sm:$0xff]  ;;  %193 = vmatpush.msra.mxu2 %v123_v20 }
  0x13   :  { %154 = vmatpush.msra.mxu0 %v116_v8  ;;  %213 = vmatpush.msra.mxu3 %v124_v24  ;;  %v101_v31 = vmax.f32 %v61_v22, 0.1  ;;  %v119_v32 = vmax.f32 %v79_v29, 0.1  ;;  %v72_v33 = vld [vmem:[#allocation5 + $0xa8] sm:$0xff]  ;;  %v73_v34 = vld [vmem:[#allocation5 + $0xb0] sm:$0xff] }
  0x14   :  { %174 = vmatpush.msra.mxu1 %v117_v27  ;;  %v112_v35 = vmax.f32 %v72_v33, 0.1  ;;  %v113_v36 = vmax.f32 %v73_v34, 0.1  ;;  %v74_v37 = vld [vmem:[#allocation5 + $0xb8] sm:$0xff]  ;;  %v51_v38 = vld [vmem:[#allocation5] sm:$0xff]  ;;  %194 = vmatpush.msra.mxu2 %v118_v28 }
  0x15   :  { %155 = vmatpush.msra.mxu0 %v111_v15  ;;  %214 = vmatpush.msra.mxu3 %v119_v32  ;;  %v96_v39 = vmax.f32 %v56_v30, 0.1  ;;  %v114_v40 = vmax.f32 %v74_v37, 0.1  ;;  %v67_v41 = vld [vmem:[#allocation5 + $0x80] sm:$0xff]  ;;  %v68_v42 = vld [vmem:[#allocation5 + $0x88] sm:$0xff] }
  0x16   :  { %175 = vmatpush.msra.mxu1 %v112_v35  ;;  %v107_v43 = vmax.f32 %v67_v41, 0.1  ;;  %v108_v44 = vmax.f32 %v68_v42, 0.1  ;;  %v69_v45 = vld [vmem:[#allocation5 + $0x90] sm:$0xff]  ;;  %v90_v46 = vld [vmem:[#allocation5 + $0x138] sm:$0xff]  ;;  %195 = vmatpush.msra.mxu2 %v113_v36 }
  0x17   :  { %156 = vmatpush.msra.mxu0 %v106_v23  ;;  %215 = vmatpush.msra.mxu3 %v114_v40  ;;  %v91_v47 = vmax.f32 %v51_v38, 0.1  ;;  %v109_v48 = vmax.f32 %v69_v45, 0.1  ;;  %v62_v49 = vld [vmem:[#allocation5 + $0x58] sm:$0xff]  ;;  %v63_v50 = vld [vmem:[#allocation5 + $0x60] sm:$0xff] }
  0x18   :  { %176 = vmatpush.msra.mxu1 %v107_v43  ;;  %v102_v51 = vmax.f32 %v62_v49, 0.1  ;;  %v103_v52 = vmax.f32 %v63_v50, 0.1  ;;  %v64_v53 = vld [vmem:[#allocation5 + $0x68] sm:$0xff]  ;;  %v85_v54 = vld [vmem:[#allocation5 + $0x110] sm:$0xff]  ;;  %196 = vmatpush.msra.mxu2 %v108_v44 }
  0x19   :  { %157 = vmatpush.msra.mxu0 %v101_v31  ;;  %216 = vmatpush.msra.mxu3 %v109_v48  ;;  %v130_v55 = vmax.f32 %v90_v46, 0.1  ;;  %v104_v56 = vmax.f32 %v64_v53, 0.1  ;;  %v125_v57 = vmax.f32 %v85_v54, 0.1 }
  0x1a   :  { %177 = vmatpush.msra.mxu1 %v102_v51  ;;  %197 = vmatpush.msra.mxu2 %v103_v52  ;;  %v57_v58 = vld [vmem:[#allocation5 + $0x30] sm:$0xff]  ;;  %v58_v59 = vld [vmem:[#allocation5 + $0x38] sm:$0xff]  ;;  %v59_v60 = vld [vmem:[#allocation5 + $0x40] sm:$0xff]  ;;  %v133_v19 = vand.u32 127, %v132_v18  ;;  %v398_v21 = vmov 0.0   ;;  %s399_s1 = smov [#allocation7]  }
  0x1b   :  { %158 = vmatpush.msra.mxu0 %v96_v39  ;;  %217 = vmatpush.msra.mxu3 %v104_v56  ;;  %v97_v61 = vmax.f32 %v57_v58, 0.1  ;;  %v98_v62 = vmax.f32 %v58_v59, 0.1  ;;  %v99_v63 = vmax.f32 %v59_v60, 0.1 }
  0x1c   :  { %v80_v0 = vld [vmem:[#allocation5 + $0xe8] sm:$0xff]  ;;  %v53_v2 = vld [vmem:[#allocation5 + $0x10] sm:$0xff]  ;;  %v54_v6 = vld [vmem:[#allocation5 + $0x18] sm:$0xff]  ;;  %s286_s2 = sshll.u32 %s399_s1, 4  ;;  %s288_s27 = sshll.u32 %s435_s3, 4  ;;  %s287_s2 = int_to_ptr.vmem [resolvable:$true] %s286_s2  ;;  %s289_s27 = int_to_ptr.hbm [resolvable:$true] %s288_s27 }
  0x1d   :  { %159 = vmatpush.msra.mxu0 %v91_v47  ;;  %v52_v1 = vld [vmem:[#allocation5 + $0x8] sm:$0xff]  ;;  %178 = vmatpush.msra.mxu1 %v97_v61  ;;  %v120_v3 = vmax.f32 %v80_v0, 0.1  ;;  %v93_v5 = vmax.f32 %v53_v2, 0.1  ;;  %v75_v7 = vld [vmem:[#allocation5 + $0xc0] sm:$0xff] }
  0x1e   :  { %198 = vmatpush.msra.mxu2 %v98_v62  ;;  %v92_v4 = vmax.f32 %v52_v1, 0.1  ;;  %218 = vmatpush.msra.mxu3 %v99_v63  ;;  %v94_v8 = vmax.f32 %v54_v6, 0.1  ;;  %v115_v9 = vmax.f32 %v75_v7, 0.1 }
  0x1f   :  { %232 = vmatpush.msrb.mxu0 %v130_v55  ;;  %v70_v10 = vld [vmem:[#allocation5 + $0x98] sm:$0xff]  ;;  %v65_v12 = vld [vmem:[#allocation5 + $0x70] sm:$0xff]  ;;  %v60_v13 = vld [vmem:[#allocation5 + $0x48] sm:$0xff] }
  0x20   :  { %179 = vmatpush.msra.mxu1 %v92_v4  ;;  %199 = vmatpush.msra.mxu2 %v93_v5  ;;  %v110_v11 = vmax.f32 %v70_v10, 0.1  ;;  %v105_v14 = vmax.f32 %v65_v12, 0.1  ;;  %v55_v15 = vld [vmem:[#allocation5 + $0x20] sm:$0xff]  ;;  %v46_v23 = vld [vmem:[#allocation2] sm:$0xff] }
  0x21   :  { %233 = vmatpush.msrb.mxu0 %v125_v57  ;;  %219 = vmatpush.msra.mxu3 %v94_v8  ;;  %v100_v16 = vmax.f32 %v60_v13, 0.1  ;;  %v95_v17 = vmax.f32 %v55_v15, 0.1  ;;  %v47_v24 = vld [vmem:[#allocation2 + $0x8] sm:$0xff]  ;;  %v48_v29 = vld [vmem:[#allocation2 + $0x10] sm:$0xff] }
  0x22   :  { %v49_v30 = vld [vmem:[#allocation2 + $0x18] sm:$0xff]  ;;  %v50_v35 = vld [vmem:[#allocation2 + $0x20] sm:$0xff] }
  0x23   :  { %234 = vmatpush.msrb.mxu0 %v120_v3 }
  0x25   :  { %235 = vmatpush.msrb.mxu0 %v115_v9 }
  0x27   :  { %236 = vmatpush.msrb.mxu0 %v110_v11 }
  0x29   :  { %237 = vmatpush.msrb.mxu0 %v105_v14 }
  0x2b   :  { %238 = vmatpush.msrb.mxu0 %v100_v16 }
  0x2d   :  { %239 = vmatpush.msrb.mxu0 %v95_v17 }
  0x7f   :  { %v136_v20 = vpop.permute.xlu0 %135 }
  0x80   :  { %vm137_vm1 = vcmp.eq.s32.totalorder %v136_v20, %v133_v19 }
  0x81   :  { %v299_v22 = vsel %vm137_vm1, 1.0, %v398_v21 }
  0x82   :  { %300 = vmatmul.msk.f32.vlgmr.msra.gmra.mxu0 %vm140_vm0, %v299_v22  ;;  %301 = vmatmul.msk.f32.vlgmr.msra.gmra.mxu1 %vm140_vm0, %v299_v22 }
  0x83   :  { %302 = vmatmul.msk.f32.vlgmr.msra.gmra.mxu2 %vm140_vm0, %v299_v22  ;;  %303 = vmatmul.msk.f32.vlgmr.msra.gmra.mxu3 %vm140_vm0, %v299_v22 }
  0x8a   :  { %304 = vmatmul.msk.f32.vlgmr.msrb.gmra.mxu0 %vm140_vm0, %v299_v22 }
  0xff   :  { %v161_v25 = vpop.f32.mrf.mxu0  ;;  %v181_v26 = vpop.f32.mrf.mxu1 }
 0x100   :  { %v244_v27 = vsub.f32 %v46_v23, %v161_v25  ;;  %v245_v28 = vsub.f32 %v47_v24, %v181_v26 }
 0x102   :  { %v249_v31 = vmul.f32 %v244_v27, %v244_v27  ;;  %v250_v32 = vmul.f32 %v245_v28, %v245_v28 }
 0x104   :  { %v254_v39 = vadd.f32 %v250_v32, %v249_v31 }
 0x106   :  { %v201_v33 = vpop.f32.mrf.mxu2  ;;  %v221_v34 = vpop.f32.mrf.mxu3 }
 0x107   :  { %v246_v36 = vsub.f32 %v48_v29, %v201_v33  ;;  %v247_v37 = vsub.f32 %v49_v30, %v221_v34  ;;  %v241_v38 = vpop.f32.mrf.mxu0 }
 0x108   :  { %v248_v41 = vsub.f32 %v50_v35, %v241_v38 }
 0x109   :  { %v251_v40 = vmul.f32 %v246_v36, %v246_v36  ;;  %v252_v43 = vmul.f32 %v247_v37, %v247_v37 }
 0x10a   :  { %v253_v45 = vmul.f32 %v248_v41, %v248_v41 }
 0x10b   :  { %v255_v42 = vadd.f32 %v254_v39, %v251_v40 }
 0x10d   :  { %v256_v44 = vadd.f32 %v255_v42, %v252_v43 }
 0x10f   :  { %v257_v46 = vadd.f32 %v256_v44, %v253_v45 }
 0x111   :  { %258 = vadd.xlane.f32.xlu0 %v257_v46 }
 0x184   :  { %v259_v47 = vpop.xlane.xlu0 %258 }
 0x185   :  { %v260_v48 = vmax.f32 %v259_v47, 1e-12 }
 0x187   :  { %v261_v49 = vmin.f32 %v260_v48, 1e+12 }
 0x189   :  { %v269_v50 = vsel %vm268_vm2, %v261_v49, 0.0 }
 0x18a   :  { %270 = vadd.xlane.f32.xlu1 %v269_v50 }
 0x1fd   :  { %v271_v51 = vpop.xlane.xlu1 %270 }
 0x1fe   :  { %v272_v52 = vrot.slane %v271_v51, 4 }
 0x200   :  { %v273_v53 = vadd.f32 %v272_v52, %v271_v51 }
 0x202   :  { %v274_v54 = vrot.slane %v273_v53, 2 }
 0x204   :  { %v275_v55 = vadd.f32 %v274_v54, %v273_v53 }
 0x206   :  { %v276_v56 = vrot.slane %v275_v55, 1 }
 0x208   :  { %v277_v57 = vadd.f32 %v276_v56, %v275_v55 }
 0x20a   :  { %305 = vpush %v277_v57 }
 0x23b   :  { %s306_s28 = spop %305 }
 0x23c   :  { %v279_v58 = vstv %s306_s28 }
 0x23d   :  { %280 = vst [vmem:[#allocation7] sm:$0x1] %v279_v58 }
 0x23e   :  { %291 = dma.vmem_to_hbm [thread:$0]  %s287_s2, 16, %s289_s27, [#allocation4]  }
 0x23f   :  { %391 = dma.done.wait [#allocation4], 16  }
 0x240   :  { %392 = vsyncadd [#allocation4], 4294967280 }
 0x241   :  { %296 = vsyncpa [#allocation3], 1 }
 0x242   :  { %297 = vsyncpa [#allocation6], 1 }
 0x243   :  { %298 = vsyncpa [#allocation4], 1 }

</bundles_post_ra>
